<compile_context>
chip_gen: v7x
topology: tpu7x:2x2x1
jax: 0.10.0
libtpu: 0.0.40
codegen_flags: <defaults>
</compile_context>

<pallas_src>
import functools

import jax
import jax.numpy as jnp
from jax.experimental import pallas as pl
from jax.experimental.pallas import tpu as pltpu

_LANE = 128


def _round_up(x, m):
    return ((x + m - 1) // m) * m


def _mlp_kernel(x_ref, w1_ref, b1_ref, w2_ref, b2_ref, w3_ref, b3_ref, o_ref,
                *, normalize):
    x = x_ref[...]                                        # (TB, D) bf16
    if normalize:
        # torch F.normalize(x, p=2, dim=1): x / max(||x||_2, 1e-12).
        xf = x.astype(jnp.float32)
        nrm = jnp.sqrt(jnp.sum(xf * xf, axis=-1, keepdims=True))
        x = (xf / jnp.maximum(nrm, 1e-12)).astype(jnp.bfloat16)

    # Layer 1: bf16 MXU matmul, f32 accumulation; bias/ReLU on the VPU in f32,
    # then immediately re-quantize to bf16 (layer 2 consumes bf16 anyway).
    h1 = jnp.dot(x, w1_ref[...], preferred_element_type=jnp.float32)
    h1 = jnp.maximum(h1 + b1_ref[...], 0.0).astype(jnp.bfloat16)
    # TODO(synk): Dropout(0.5)/Dropout(0.3) are identity in eval mode; training
    # would use pltpu.prng_seed + pltpu.prng_random_bits here.

    h2 = jnp.dot(h1, w2_ref[...], preferred_element_type=jnp.float32)
    h2 = jnp.maximum(h2 + b2_ref[...], 0.0).astype(jnp.bfloat16)

    out = jnp.dot(h2, w3_ref[...], preferred_element_type=jnp.float32)
    o_ref[...] = (out + b3_ref[...]).astype(o_ref.dtype)


def prepare_params(params):
    """One-time bf16 cast + lane padding of the weights.

    Call once and reuse the result across forward calls (the review flagged the
    per-call repack as wasted HBM traffic / XLA scatter ops).
    """
    w1, b1, w2, b2, w3, b3 = params                 # weights stored (in, out)
    num_classes = w3.shape[1]
    n_pad = _round_up(max(num_classes, _LANE), _LANE)   # lane-dense output width

    w1p = w1.astype(jnp.bfloat16)                   # K = D, no row padding
    w2p = w2.astype(jnp.bfloat16)
    w3p = jnp.zeros((w3.shape[0], n_pad), jnp.bfloat16).at[:, :num_classes].set(
        w3.astype(jnp.bfloat16))
    b1p = b1.reshape(1, -1).astype(jnp.float32)
    b2p = b2.reshape(1, -1).astype(jnp.float32)
    b3p = jnp.zeros((1, n_pad), jnp.float32).at[:, :num_classes].set(
        b3.reshape(1, -1))
    return (w1p, b1p, w2p, b2p, w3p, b3p, num_classes)


def single_embedding_forward(x1, prepared, *, normalize=False, block_b=512,
                             out_dtype=jnp.float32):
    """Forward pass of SingleEmbeddingModel via one fused Pallas kernel."""
    w1p, b1p, w2p, b2p, w3p, b3p, num_classes = prepared
    B, D = x1.shape
    h1_dim, h2_dim = w1p.shape[1], w2p.shape[1]
    n_pad = w3p.shape[1]

    # bf16 activation stream, no feature/batch padding in HBM.
    xb = x1.astype(jnp.bfloat16)

    # Batch tile: multiple of 8 sublanes, capped so B > 8 yields >= 2 grid
    # steps (v7x megacore sharding); ragged last tile handled by Pallas.
    tb = min(block_b, _round_up(B, 8))
    tb = min(tb, max(8, _round_up(pl.cdiv(B, 2), 8)))
    grid = (pl.cdiv(B, tb),)

    kernel = functools.partial(_mlp_kernel, normalize=normalize)

    out = pl.pallas_call(
        kernel,
        out_shape=jax.ShapeDtypeStruct((B, n_pad), out_dtype),
        grid=grid,
        in_specs=[
            pl.BlockSpec((tb, D), lambda i: (i, 0)),           # activation stream
            pl.BlockSpec((D, h1_dim), lambda i: (0, 0)),       # weights: constant
            pl.BlockSpec((1, h1_dim), lambda i: (0, 0)),       #   index_maps so
            pl.BlockSpec((h1_dim, h2_dim), lambda i: (0, 0)),  #   they stay VMEM
            pl.BlockSpec((1, h2_dim), lambda i: (0, 0)),       #   resident
            pl.BlockSpec((h2_dim, n_pad), lambda i: (0, 0)),
            pl.BlockSpec((1, n_pad), lambda i: (0, 0)),
        ],
        out_specs=pl.BlockSpec((tb, n_pad), lambda i: (i, 0)),
        compiler_params=pltpu.CompilerParams(
            dimension_semantics=("parallel",)),                # v7x: 2 TCs
    )(xb, w1p, b1p, w2p, b2p, w3p, b3p)

    return out[:, :num_classes]


def init_params(key, embed_dim1, num_classes):
    """Deterministic synthetic parameters (shapes match the PyTorch module)."""
    dims = [(embed_dim1, 1024), (1024, 256), (256, num_classes)]
    params = []
    for fan_in, fan_out in dims:
        key, kw, kb = jax.random.split(key, 3)
        bound = 1.0 / jnp.sqrt(jnp.float32(fan_in))
        # Stored as (in, out) == transpose of PyTorch nn.Linear.weight.
        w = jax.random.uniform(kw, (fan_in, fan_out), jnp.float32, -bound, bound)
        b = jax.random.uniform(kb, (1, fan_out), jnp.float32, -bound, bound)
        params.extend([w, b])
    return tuple(params)


def reference_forward(x1, params, *, normalize=False):
    w1, b1, w2, b2, w3, b3 = params
    x = x1
    if normalize:
        x = x / jnp.maximum(jnp.linalg.norm(x, axis=1, keepdims=True), 1e-12)
    h1 = jnp.maximum(x @ w1 + b1, 0.0)
    h2 = jnp.maximum(h1 @ w2 + b2, 0.0)
    return h2 @ w3 + b3


if __name__ == "__main__":
    embed_dim1 = 64
    num_classes = 10
    batch = 8

    key = jax.random.PRNGKey(0)
    kx, kp = jax.random.split(key)
    x1 = jax.random.normal(kx, (batch, embed_dim1), jnp.float32)
    params = init_params(kp, embed_dim1, num_classes)
    prepared = prepare_params(params)   # one-time weight repack, reused below

    for normalize in (False, True):
        out = single_embedding_forward(x1, prepared, normalize=normalize)
        out = jax.block_until_ready(out)
        ref = reference_forward(x1, params, normalize=normalize)
        assert out.shape == (batch, num_classes), out.shape
        # bf16 MXU inputs/intermediates with f32 accumulation -> loose tolerance.
        err = float(jnp.max(jnp.abs(out - ref)))
        assert jnp.allclose(out, ref, atol=2e-2, rtol=2e-2), (
            f"mismatch vs reference (normalize={normalize}): max abs err {err:e}")

    print("KERNEL_OK")
</pallas_src>

<mosaic_0001>
module attributes {stable_mosaic.version = 11 : i64} {
  func.func @_mlp_kernel(%arg0: i32, %arg1: memref<8x64xbf16, #tpu.memory_space<vmem>>, %arg2: memref<64x1024xbf16, #tpu.memory_space<vmem>>, %arg3: memref<1x1024xf32, #tpu.memory_space<vmem>>, %arg4: memref<1024x256xbf16, #tpu.memory_space<vmem>>, %arg5: memref<1x256xf32, #tpu.memory_space<vmem>>, %arg6: memref<256x128xbf16, #tpu.memory_space<vmem>>, %arg7: memref<1x128xf32, #tpu.memory_space<vmem>>, %arg8: memref<8x128xf32, #tpu.memory_space<vmem>>) attributes {dimension_semantics = [#tpu.dimension_semantics<parallel>], iteration_bounds = array<i64: 1>, scalar_prefetch = 0 : i64, scratch_operands = 0 : i64, tpu.core_type = #tpu.core_type<tc>, window_params = [{transform_indices = @transform_0, window_bounds = array<i64: 8, 64>}, {pipeline_mode = #tpu.pipeline_mode<synchronous>, transform_indices = @transform_1, window_bounds = array<i64: 64, 1024>}, {pipeline_mode = #tpu.pipeline_mode<synchronous>, transform_indices = @transform_2, window_bounds = array<i64: 1, 1024>}, {pipeline_mode = #tpu.pipeline_mode<synchronous>, transform_indices = @transform_3, window_bounds = array<i64: 1024, 256>}, {pipeline_mode = #tpu.pipeline_mode<synchronous>, transform_indices = @transform_4, window_bounds = array<i64: 1, 256>}, {pipeline_mode = #tpu.pipeline_mode<synchronous>, transform_indices = @transform_5, window_bounds = array<i64: 256, 128>}, {pipeline_mode = #tpu.pipeline_mode<synchronous>, transform_indices = @transform_6, window_bounds = array<i64: 1, 128>}, {transform_indices = @transform_7, window_bounds = array<i64: 8, 128>}]} {
    %c0 = arith.constant 0 : index
    %c0_0 = arith.constant 0 : index
    %0 = vector.load %arg1[%c0, %c0_0] : memref<8x64xbf16, #tpu.memory_space<vmem>>, vector<8x64xbf16>
    %c0_1 = arith.constant 0 : index
    %c0_2 = arith.constant 0 : index
    %1 = vector.load %arg2[%c0_1, %c0_2] : memref<64x1024xbf16, #tpu.memory_space<vmem>>, vector<64x1024xbf16>
    %cst = arith.constant dense<0.000000e+00> : vector<8x1024xf32>
    %2 = tpu.matmul %0, %1, %cst {dimension_numbers = #tpu.dot_dimension_numbers<[1], [0], [0], [1], [0, 0, 1, 1], [], []>} : vector<8x64xbf16>, vector<64x1024xbf16>, vector<8x1024xf32> -> vector<8x1024xf32>
    %c0_3 = arith.constant 0 : index
    %c0_4 = arith.constant 0 : index
    %3 = vector.load %arg3[%c0_3, %c0_4] : memref<1x1024xf32, #tpu.memory_space<vmem>>, vector<1x1024xf32>
    %4 = vector.broadcast %3 : vector<1x1024xf32> to vector<8x1024xf32>
    %5 = arith.addf %2, %4 : vector<8x1024xf32>
    %cst_5 = arith.constant 0.000000e+00 : f32
    %6 = vector.broadcast %cst_5 : f32 to vector<8x1024xf32>
    %7 = arith.maximumf %5, %6 : vector<8x1024xf32>
    %8 = arith.truncf %7 : vector<8x1024xf32> to vector<8x1024xbf16>
    %c0_6 = arith.constant 0 : index
    %c0_7 = arith.constant 0 : index
    %9 = vector.load %arg4[%c0_6, %c0_7] : memref<1024x256xbf16, #tpu.memory_space<vmem>>, vector<1024x256xbf16>
    %cst_8 = arith.constant dense<0.000000e+00> : vector<8x256xf32>
    %10 = tpu.matmul %8, %9, %cst_8 {dimension_numbers = #tpu.dot_dimension_numbers<[1], [0], [0], [1], [0, 0, 1, 1], [], []>} : vector<8x1024xbf16>, vector<1024x256xbf16>, vector<8x256xf32> -> vector<8x256xf32>
    %c0_9 = arith.constant 0 : index
    %c0_10 = arith.constant 0 : index
    %11 = vector.load %arg5[%c0_9, %c0_10] : memref<1x256xf32, #tpu.memory_space<vmem>>, vector<1x256xf32>
    %12 = vector.broadcast %11 : vector<1x256xf32> to vector<8x256xf32>
    %13 = arith.addf %10, %12 : vector<8x256xf32>
    %cst_11 = arith.constant 0.000000e+00 : f32
    %14 = vector.broadcast %cst_11 : f32 to vector<8x256xf32>
    %15 = arith.maximumf %13, %14 : vector<8x256xf32>
    %16 = arith.truncf %15 : vector<8x256xf32> to vector<8x256xbf16>
    %c0_12 = arith.constant 0 : index
    %c0_13 = arith.constant 0 : index
    %17 = vector.load %arg6[%c0_12, %c0_13] : memref<256x128xbf16, #tpu.memory_space<vmem>>, vector<256x128xbf16>
    %cst_14 = arith.constant dense<0.000000e+00> : vector<8x128xf32>
    %18 = tpu.matmul %16, %17, %cst_14 {dimension_numbers = #tpu.dot_dimension_numbers<[1], [0], [0], [1], [0, 0, 1, 1], [], []>} : vector<8x256xbf16>, vector<256x128xbf16>, vector<8x128xf32> -> vector<8x128xf32>
    %c0_15 = arith.constant 0 : index
    %c0_16 = arith.constant 0 : index
    %19 = vector.load %arg7[%c0_15, %c0_16] : memref<1x128xf32, #tpu.memory_space<vmem>>, vector<1x128xf32>
    %20 = vector.broadcast %19 : vector<1x128xf32> to vector<8x128xf32>
    %21 = arith.addf %18, %20 : vector<8x128xf32>
    %c0_17 = arith.constant 0 : index
    %c0_18 = arith.constant 0 : index
    %22 = vector.load %arg8[%c0_17, %c0_18] : memref<8x128xf32, #tpu.memory_space<vmem>>, vector<8x128xf32>
    tpu.vector_store %arg8[%c0_17, %c0_18], %21 {strides = array<i32>} : memref<8x128xf32, #tpu.memory_space<vmem>>, vector<8x128xf32>,
    return
  }
  func.func @transform_0(%arg0: i32) -> (i32, i32) {
    %c0_i32 = arith.constant 0 : i32
    %c0_i32_0 = arith.constant 0 : i32
    return %arg0, %c0_i32 : i32, i32
  }
  func.func @transform_1(%arg0: i32) -> (i32, i32) {
    %c0_i32 = arith.constant 0 : i32
    %c0_i32_0 = arith.constant 0 : i32
    %c0_i32_1 = arith.constant 0 : i32
    return %c0_i32, %c0_i32_0 : i32, i32
  }
  func.func @transform_2(%arg0: i32) -> (i32, i32) {
    %c0_i32 = arith.constant 0 : i32
    %c0_i32_0 = arith.constant 0 : i32
    %c0_i32_1 = arith.constant 0 : i32
    return %c0_i32, %c0_i32_0 : i32, i32
  }
  func.func @transform_3(%arg0: i32) -> (i32, i32) {
    %c0_i32 = arith.constant 0 : i32
    %c0_i32_0 = arith.constant 0 : i32
    %c0_i32_1 = arith.constant 0 : i32
    return %c0_i32, %c0_i32_0 : i32, i32
  }
  func.func @transform_4(%arg0: i32) -> (i32, i32) {
    %c0_i32 = arith.constant 0 : i32
    %c0_i32_0 = arith.constant 0 : i32
    %c0_i32_1 = arith.constant 0 : i32
    return %c0_i32, %c0_i32_0 : i32, i32
  }
  func.func @transform_5(%arg0: i32) -> (i32, i32) {
    %c0_i32 = arith.constant 0 : i32
    %c0_i32_0 = arith.constant 0 : i32
    %c0_i32_1 = arith.constant 0 : i32
    return %c0_i32, %c0_i32_0 : i32, i32
  }
  func.func @transform_6(%arg0: i32) -> (i32, i32) {
    %c0_i32 = arith.constant 0 : i32
    %c0_i32_0 = arith.constant 0 : i32
    %c0_i32_1 = arith.constant 0 : i32
    return %c0_i32, %c0_i32_0 : i32, i32
  }
  func.func @transform_7(%arg0: i32) -> (i32, i32) {
    %c0_i32 = arith.constant 0 : i32
    %c0_i32_0 = arith.constant 0 : i32
    return %arg0, %c0_i32 : i32, i32
  }
}

</mosaic_0001>

<bundles_post_ra>
// kernel: tpu_custom_call.1
= control target key start
LH: loop header
LB: loop body
LE: loop exit
PB: predicated region body
PF: predicated region fallthrough
CT: control target
= control target key end

     0   :  { %12 = vsyncpa [#allocation3], 0  ;;  %s2407_s0 = inlined_call_operand.hbm [shape: bf16[8,64], index: 0, kind: input, shape index: {}]   ;;  %s2408_s1 = inlined_call_operand.hbm [shape: bf16[64,1024], index: 1, kind: input, shape index: {}]   ;;  %s2409_s2 = inlined_call_operand.hbm [shape: f32[1,1024], index: 2, kind: input, shape index: {}]   ;;  %s2410_s3 = inlined_call_operand.hbm [shape: bf16[1024,256], index: 3, kind: input, shape index: {}]   ;;  %s2411_s4 = inlined_call_operand.vmem [shape: f32[1,256], index: 4, kind: input, shape index: {}]   ;;  %s2412_s5 = inlined_call_operand.hbm [shape: bf16[256,128], index: 5, kind: input, shape index: {}]   ;;  %s2413_s6 = inlined_call_operand.vmem [shape: f32[1,128], index: 6, kind: input, shape index: {}]   ;;  %s2414_s7 = inlined_call_operand.hbm [shape: f32[8,128], index: 7, kind: output, shape index: {}]  }
   0x1   :  { %13 = vsyncpa [#allocation6], 0 }
   0x2   :  { %14 = vsyncpa [#allocation9], 0 }
   0x3   :  { %15 = vsyncpa [#allocation4], 0  ;;  %s2228_s24 = smov [#allocation5]   ;;  %s2088_s28 = scalar_lea.hbm %s2408_s1, 4096 }
   0x4   :  { %s31_s25 = sshll.u32 %s2228_s24, 4  ;;  %p2089_p0 = scmp.ne.s32.totalorder %s2408_s1, %s2088_s28  ;;  %s32_s25 = int_to_ptr.vmem [resolvable:$true] %s31_s25 }
   0x5   :  { %p2092_p1 = scmp.lt.u32.totalorder %s2088_s28, %s2408_s1 }
   0x7   :  { %p2094_p2 = pnand %p2092_p1, %p2089_p0 }
   0x9   :  { %2097 = shalt.err (!%p2094_p2)
}
   0xa   :  { %s2098_s10 = scalar_lea.vmem %s32_s25, 4096  ;;  %p2103_p4 = scmp.lt.s32.totalorder %s32_s25, %s32_s25 }
   0xb   :  { %p2099_p3 = scmp.ne.s32.totalorder %s32_s25, %s2098_s10  ;;  %p2104_p5 = scmp.lt.s32.totalorder %s2098_s10, %s2098_s10 }
   0xd   :  { %p2105_p6 = por %p2104_p5, %p2103_p4 }
   0xf   :  { %p2106_p7 = pnand %p2105_p6, %p2099_p3 }
  0x11   :  { %2109 = shalt.err (!%p2106_p7)
}
  0x12   :  { %s2229_s11 = smov 512   ;;  %s2230_s12 = smov 32  }
  0x13   :  { %37 = dma.hbm_to_vmem [thread:$0]  %s2408_s1, 4096, %s32_s25, [#allocation6], %s2229_s11, %s2229_s11, %s2230_s12  }
  0x14   :  { %s2231_s15 = smov [#allocation8]   ;;  %s2110_s19 = scalar_lea.hbm %s2410_s3, 16384 }
  0x15   :  { %s53_s16 = sshll.u32 %s2231_s15, 4  ;;  %p2111_p8 = scmp.ne.s32.totalorder %s2410_s3, %s2110_s19  ;;  %s54_s16 = int_to_ptr.vmem [resolvable:$true] %s53_s16 }
  0x16   :  { %p2114_p9 = scmp.lt.u32.totalorder %s2110_s19, %s2410_s3 }
  0x18   :  { %p2116_p10 = pnand %p2114_p9, %p2111_p8 }
  0x1a   :  { %2119 = shalt.err (!%p2116_p10)
}
  0x1b   :  { %s2120_s24 = scalar_lea.vmem %s54_s16, 16384  ;;  %p2125_p12 = scmp.lt.s32.totalorder %s54_s16, %s54_s16 }
  0x1c   :  { %p2121_p11 = scmp.ne.s32.totalorder %s54_s16, %s2120_s24  ;;  %p2126_p13 = scmp.lt.s32.totalorder %s2120_s24, %s2120_s24 }
  0x1e   :  { %p2127_p0 = por %p2126_p13, %p2125_p12 }
  0x20   :  { %p2128_p1 = pnand %p2127_p0, %p2121_p11 }
  0x22   :  { %2131 = shalt.err (!%p2128_p1)
}
  0x23   :  { %s2232_s1 = smov 128   ;;  %s2233_s25 = smov 8  }
  0x24   :  { %59 = dma.hbm_to_vmem [thread:$0]  %s2410_s3, 16384, %s54_s16, [#allocation9], %s2232_s1, %s2232_s1, %s2233_s25  }
  0x25   :  { %s2234_s28 = smov [#allocation2]   ;;  %s2235_s30 = smov [#allocation7]  }
  0x26   :  { %s22_s29 = sshll.u32 %s2234_s28, 4  ;;  %s44_s8 = sshll.u32 %s2235_s30, 4  ;;  %s23_s29 = int_to_ptr.vmem [resolvable:$true] %s22_s29  ;;  %s45_s8 = int_to_ptr.vmem [resolvable:$true] %s44_s8 }
  0x27   :  { %s2132_s11 = scalar_lea.hbm %s2407_s0, 64 }
  0x28   :  { %p2133_p2 = scmp.ne.s32.totalorder %s2407_s0, %s2132_s11  ;;  %p2136_p3 = scmp.lt.u32.totalorder %s2132_s11, %s2407_s0 }
  0x2a   :  { %p2138_p4 = pnand %p2136_p3, %p2133_p2 }
  0x2c   :  { %2141 = shalt.err (!%p2138_p4)
}
  0x2d   :  { %s2142_s3 = scalar_lea.vmem %s23_s29, 64  ;;  %p2147_p6 = scmp.lt.s32.totalorder %s23_s29, %s23_s29 }
  0x2e   :  { %p2143_p5 = scmp.ne.s32.totalorder %s23_s29, %s2142_s3  ;;  %p2148_p7 = scmp.lt.s32.totalorder %s2142_s3, %s2142_s3 }
  0x30   :  { %p2149_p8 = por %p2148_p7, %p2147_p6 }
  0x32   :  { %p2150_p9 = pnand %p2149_p8, %p2143_p5 }
  0x34   :  { %2153 = shalt.err (!%p2150_p9)
}
  0x35   :  { %25 = dma.hbm_to_vmem [thread:$0]  %s2407_s0, 64, %s23_s29, [#allocation3]  }
  0x36   :  { %s2154_s20 = scalar_lea.hbm %s2409_s2, 128 }
  0x37   :  { %p2155_p10 = scmp.ne.s32.totalorder %s2409_s2, %s2154_s20  ;;  %p2158_p11 = scmp.lt.u32.totalorder %s2154_s20, %s2409_s2 }
  0x39   :  { %p2160_p12 = pnand %p2158_p11, %p2155_p10 }
  0x3b   :  { %2163 = shalt.err (!%p2160_p12)
}
  0x3c   :  { %s2164_s1 = scalar_lea.vmem %s45_s8, 128  ;;  %p2169_p0 = scmp.lt.s32.totalorder %s45_s8, %s45_s8 }
  0x3d   :  { %p2165_p13 = scmp.ne.s32.totalorder %s45_s8, %s2164_s1  ;;  %p2170_p1 = scmp.lt.s32.totalorder %s2164_s1, %s2164_s1 }
  0x3f   :  { %p2171_p2 = por %p2170_p1, %p2169_p0 }
  0x41   :  { %p2172_p3 = pnand %p2171_p2, %p2165_p13 }
  0x43   :  { %2175 = shalt.err (!%p2172_p3)
}
  0x44   :  { %47 = dma.hbm_to_vmem [thread:$0]  %s2409_s2, 128, %s45_s8, [#allocation6]  }
  0x45   :  { %s2236_s26 = smov [#allocation10]   ;;  %s2176_s30 = scalar_lea.hbm %s2412_s5, 2048 }
  0x46   :  { %s67_s27 = sshll.u32 %s2236_s26, 4  ;;  %p2177_p4 = scmp.ne.s32.totalorder %s2412_s5, %s2176_s30  ;;  %s68_s27 = int_to_ptr.vmem [resolvable:$true] %s67_s27 }
  0x47   :  { %p2180_p5 = scmp.lt.u32.totalorder %s2176_s30, %s2412_s5 }
  0x49   :  { %p2182_p6 = pnand %p2180_p5, %p2177_p4 }
  0x4b   :  { %2185 = shalt.err (!%p2182_p6)
}
  0x4c   :  { %s2186_s13 = scalar_lea.vmem %s68_s27, 2048  ;;  %p2191_p8 = scmp.lt.s32.totalorder %s68_s27, %s68_s27 }
  0x4d   :  { %p2187_p7 = scmp.ne.s32.totalorder %s68_s27, %s2186_s13  ;;  %p2192_p9 = scmp.lt.s32.totalorder %s2186_s13, %s2186_s13 }
  0x4f   :  { %p2193_p10 = por %p2192_p9, %p2191_p8 }
  0x51   :  { %p2194_p11 = pnand %p2193_p10, %p2187_p7 }
  0x53   :  { %2197 = shalt.err (!%p2194_p11)
}
  0x54   :  { %s2237_s2 = smov 64   ;;  %s2238_s8 = smov 4  }
  0x55   :  { %73 = dma.hbm_to_vmem [thread:$0]  %s2412_s5, 2048, %s68_s27, [#allocation9], %s2237_s2, %s2237_s2, %s2238_s8  }
  0x56   :  { %2220 = dma.done.wait [#allocation3], 64  }
  0x57   :  { %2221 = vsyncadd [#allocation3], 4294967232 }
  0x58   :  { %2222 = dma.done.wait [#allocation6], 4224  }
  0x59   :  { %2223 = vsyncadd [#allocation6], 4294963072 }
  0x5a   :  { %2224 = dma.done.wait [#allocation9], 18432  }
  0x5b   :  { %2225 = vsyncadd [#allocation9], 4294948864  ;;  %v2239_v0 = vmov 0   ;;  %v93_v1 = vld [vmem:[#allocation5] sm:$0xff]  ;;  %v96_v15 = vld [vmem:[#allocation5 + $0x18] sm:$0xff]  ;;  %vm327_vm0 = vcmask 523264  }
  0x5c   :  { %363 = vmatprep.mubr.bf16.mxu0 %v2239_v0  ;;  %486 = vmatprep.mubr.bf16.mxu1 %v2239_v0  ;;  %v97_v2 = vld [vmem:[#allocation5 + $0x20] sm:$0xff]  ;;  %v100_v16 = vld [vmem:[#allocation5 + $0x38] sm:$0xff]  ;;  %v94_v18 = vld [vmem:[#allocation5 + $0x8] sm:$0xff]  ;;  %s2240_s17 = smov [#allocation11]  }
  0x5d   :  { %v101_v3 = vld [vmem:[#allocation5 + $0x40] sm:$0xff]  ;;  %v1653_v4 = vcombine.high %v93_v1, %v97_v2  ;;  %v1652_v5 = vcombine.low %v93_v1, %v97_v2  ;;  %v1659_v19 = vcombine.high %v96_v15, %v100_v16  ;;  %v1658_v20 = vcombine.low %v96_v15, %v100_v16  ;;  %v104_v21 = vld [vmem:[#allocation5 + $0x58] sm:$0xff]  ;;  %v98_v23 = vld [vmem:[#allocation5 + $0x28] sm:$0xff]  ;;  %s1641_s18 = sshll.u32 %s2240_s17, 4  ;;  %s1642_s18 = int_to_ptr.vmem [resolvable:$true] %s1641_s18 }
  0x5e   :  { %v105_v6 = vld [vmem:[#allocation5 + $0x60] sm:$0xff]  ;;  %v108_v22 = vld [vmem:[#allocation5 + $0x78] sm:$0xff]  ;;  %v1655_v29 = vcombine.high %v94_v18, %v98_v23  ;;  %v102_v30 = vld [vmem:[#allocation5 + $0x48] sm:$0xff]  ;;  %v1654_v36 = vcombine.low %v94_v18, %v98_v23  ;;  %s2198_s19 = scalar_lea.vmem %s1642_s18, 128  ;;  %p2203_p13 = scmp.lt.s32.totalorder %s1642_s18, %s1642_s18 }
  0x5f   :  { %v1661_v7 = vcombine.high %v101_v3, %v105_v6  ;;  %v109_v8 = vld [vmem:[#allocation5 + $0x80] sm:$0xff]  ;;  %331 = vmatprep.subr.bf16.mxu0 %v1653_v4  ;;  %v1660_v10 = vcombine.low %v101_v3, %v105_v6  ;;  %v1667_v24 = vcombine.high %v104_v21, %v108_v22  ;;  %v112_v25 = vld [vmem:[#allocation5 + $0x98] sm:$0xff]  ;;  %454 = vmatprep.subr.bf16.mxu1 %v1659_v19  ;;  %v106_v32 = vld [vmem:[#allocation5 + $0x68] sm:$0xff]  ;;  %p2199_p12 = scmp.ne.s32.totalorder %s1642_s18, %s2198_s19  ;;  %p2204_p0 = scmp.lt.s32.totalorder %s2198_s19, %s2198_s19 }
  0x60   :  { %v113_v9 = vld [vmem:[#allocation5 + $0xa0] sm:$0xff]  ;;  %332 = vmatpush1.bf16.msra.mxu0 %v1652_v5  ;;  %v116_v26 = vld [vmem:[#allocation5 + $0xb8] sm:$0xff]  ;;  %455 = vmatpush1.bf16.msra.mxu1 %v1658_v20  ;;  %v1666_v28 = vcombine.low %v104_v21, %v108_v22  ;;  %v1663_v37 = vcombine.high %v102_v30, %v106_v32  ;;  %v110_v39 = vld [vmem:[#allocation5 + $0x88] sm:$0xff]  ;;  %v1662_v42 = vcombine.low %v102_v30, %v106_v32 }
  0x61   :  { %333 = vmatprep.subr.bf16.mxu0 %v1661_v7  ;;  %v1669_v11 = vcombine.high %v109_v8, %v113_v9  ;;  %v117_v12 = vld [vmem:[#allocation5 + $0xc0] sm:$0xff]  ;;  %v1668_v14 = vcombine.low %v109_v8, %v113_v9  ;;  %456 = vmatprep.subr.bf16.mxu1 %v1667_v24  ;;  %v1675_v31 = vcombine.high %v112_v25, %v116_v26  ;;  %v120_v33 = vld [vmem:[#allocation5 + $0xd8] sm:$0xff]  ;;  %v114_v40 = vld [vmem:[#allocation5 + $0xa8] sm:$0xff]  ;;  %p2205_p1 = por %p2204_p0, %p2203_p13 }
  0x62   :  { %v121_v13 = vld [vmem:[#allocation5 + $0xe0] sm:$0xff]  ;;  %v124_v34 = vld [vmem:[#allocation5 + $0xf8] sm:$0xff]  ;;  %v1674_v38 = vcombine.low %v112_v25, %v116_v26  ;;  %v1671_v43 = vcombine.high %v110_v39, %v114_v40  ;;  %v118_v44 = vld [vmem:[#allocation5 + $0xc8] sm:$0xff]  ;;  %v1670_v48 = vcombine.low %v110_v39, %v114_v40 }
  0x63   :  { %v1677_v17 = vcombine.high %v117_v12, %v121_v13  ;;  %v1676_v27 = vcombine.low %v117_v12, %v121_v13  ;;  %v2343_v35 = vld [vmem:[#allocation2] sm:$0xf]  ;;  %v1683_v41 = vcombine.high %v120_v33, %v124_v34  ;;  %v1682_v45 = vcombine.low %v120_v33, %v124_v34  ;;  %v122_v46 = vld [vmem:[#allocation5 + $0xe8] sm:$0xff]  ;;  %v95_v50 = vld [vmem:[#allocation5 + $0x10] sm:$0xff]  ;;  %p2206_p2 = pnand %p2205_p1, %p2199_p12 }
  0x64   :  { %334 = vmatpush1.bf16.msra.mxu0 %v1660_v10  ;;  %457 = vmatpush1.bf16.msra.mxu1 %v1666_v28  ;;  %v1882_v47 = vld [vmem:[#allocation8 + $0x4] ss:$8 sps:$4 sm:$0xff]   ;;  %v1679_v49 = vcombine.high %v118_v44, %v122_v46  ;;  %v1880_v51 = vld [vmem:[#allocation8] ss:$8 sps:$4 sm:$0xff]   ;;  %v1885_v53 = vld [vmem:[#allocation8 + $0x14] ss:$8 sps:$4 sm:$0xff]   ;;  %v1678_v54 = vcombine.low %v118_v44, %v122_v46 }
  0x65   :  { %335 = vmatprep.subr.bf16.mxu0 %v1669_v11  ;;  %458 = vmatprep.subr.bf16.mxu1 %v1675_v31  ;;  %v99_v52 = vld [vmem:[#allocation5 + $0x30] sm:$0xff]  ;;  %v1883_v57 = vld [vmem:[#allocation8 + $0x10] ss:$8 sps:$4 sm:$0xff]   ;;  %v1891_v2 = vld [vmem:[#allocation8 + $0x34] ss:$8 sps:$4 sm:$0xff]  }
  0x66   :  { %v1657_v55 = vcombine.high %v95_v50, %v99_v52  ;;  %v103_v56 = vld [vmem:[#allocation5 + $0x50] sm:$0xff]  ;;  %v1656_v60 = vcombine.low %v95_v50, %v99_v52  ;;  %v1889_v7 = vld [vmem:[#allocation8 + $0x30] ss:$8 sps:$4 sm:$0xff]   ;;  %v1897_v11 = vld [vmem:[#allocation8 + $0x54] ss:$8 sps:$4 sm:$0xff]  }
  0x67   :  { %v107_v58 = vld [vmem:[#allocation5 + $0x70] sm:$0xff]  ;;  %v1895_v13 = vld [vmem:[#allocation8 + $0x50] ss:$8 sps:$4 sm:$0xff]   ;;  %v1915_v18 = vld [vmem:[#allocation8 + $0x214] ss:$8 sps:$4 sm:$0xff]  }
  0x68   :  { %336 = vmatpush1.bf16.msra.mxu0 %v1668_v14  ;;  %459 = vmatpush1.bf16.msra.mxu1 %v1674_v38  ;;  %v1888_v59 = vld [vmem:[#allocation8 + $0x24] ss:$8 sps:$4 sm:$0xff]   ;;  %v1665_v61 = vcombine.high %v103_v56, %v107_v58  ;;  %v1886_v63 = vld [vmem:[#allocation8 + $0x20] ss:$8 sps:$4 sm:$0xff]   ;;  %v1664_v3 = vcombine.low %v103_v56, %v107_v58  ;;  %v1903_v19 = vld [vmem:[#allocation8 + $0x74] ss:$8 sps:$4 sm:$0xff]  }
  0x69   :  { %337 = vmatprep.subr.bf16.mxu0 %v1677_v17  ;;  %460 = vmatprep.subr.bf16.mxu1 %v1683_v41  ;;  %v111_v62 = vld [vmem:[#allocation5 + $0x90] sm:$0xff]  ;;  %v1913_v20 = vld [vmem:[#allocation8 + $0x210] ss:$8 sps:$4 sm:$0xff]   ;;  %v1927_v26 = vld [vmem:[#allocation8 + $0x234] ss:$8 sps:$4 sm:$0xff]  }
  0x6a   :  { %v115_v1 = vld [vmem:[#allocation5 + $0xb0] sm:$0xff]  ;;  %v1901_v21 = vld [vmem:[#allocation8 + $0x70] ss:$8 sps:$4 sm:$0xff]   ;;  %v1939_v34 = vld [vmem:[#allocation8 + $0x254] ss:$8 sps:$4 sm:$0xff]  }
  0x6b   :  { %v119_v4 = vld [vmem:[#allocation5 + $0xd0] sm:$0xff]  ;;  %v1673_v5 = vcombine.high %v111_v62, %v115_v1  ;;  %v1672_v10 = vcombine.low %v111_v62, %v115_v1  ;;  %v1925_v28 = vld [vmem:[#allocation8 + $0x230] ss:$8 sps:$4 sm:$0xff]   ;;  %v1936_v40 = vld [vmem:[#allocation8 + $0xd4] ss:$8 sps:$4 sm:$0xff]  }
  0x6c   :  { %338 = vmatpush1.bf16.msra.mxu0 %v1676_v27  ;;  %461 = vmatpush1.bf16.msra.mxu1 %v1682_v45  ;;  %v123_v6 = vld [vmem:[#allocation5 + $0xf0] sm:$0xff]  ;;  %v1912_v27 = vld [vmem:[#allocation8 + $0x94] ss:$8 sps:$4 sm:$0xff]   ;;  %v1934_v41 = vld [vmem:[#allocation8 + $0xd0] ss:$8 sps:$4 sm:$0xff]  }
  0x6d   :  { %372 = vmatprep.subr.bf16.mxu0 %v1655_v29  ;;  %1291 = vmatprep.subr.bf16.mxu1 %v1882_v47  ;;  %v1894_v8 = vld [vmem:[#allocation8 + $0x44] ss:$8 sps:$4 sm:$0xff]   ;;  %v1892_v9 = vld [vmem:[#allocation8 + $0x40] ss:$8 sps:$4 sm:$0xff]   ;;  %v1681_v12 = vcombine.high %v119_v4, %v123_v6  ;;  %v1680_v15 = vcombine.low %v119_v4, %v123_v6  ;;  %v1910_v29 = vld [vmem:[#allocation8 + $0x90] ss:$8 sps:$4 sm:$0xff]  }
  0x6e   :  { %v1909_v14 = vld [vmem:[#allocation8 + $0x204] ss:$8 sps:$4 sm:$0xff]   ;;  %v1907_v16 = vld [vmem:[#allocation8 + $0x200] ss:$8 sps:$4 sm:$0xff]   ;;  %v1948_v46 = vld [vmem:[#allocation8 + $0xf4] ss:$8 sps:$4 sm:$0xff]  }
  0x6f   :  { %1684 = vmatmul.mubr.msk.bf16.vlgmr.msra.gmra.mrb[0].mxu0 %vm327_vm0, %v2343_v35  ;;  %1687 = vmatmul.mubr.msk.bf16.vlgmr.msra.gmra.mrb[0].mxu1 %vm327_vm0, %v2343_v35  ;;  %v1898_v17 = vld [vmem:[#allocation8 + $0x60] ss:$8 sps:$4 sm:$0xff]   ;;  %v1921_v22 = vld [vmem:[#allocation8 + $0x224] ss:$8 sps:$4 sm:$0xff]   ;;  %v1951_v47 = vld [vmem:[#allocation8 + $0x274] ss:$8 sps:$4 sm:$0xff]  }
  0x70   :  { %373 = vmatpush1.bf16.msra.mxu0 %v1654_v36  ;;  %404 = vmatprep.mubr.bf16.mxu0 %v2239_v0  ;;  %v1906_v23 = vld [vmem:[#allocation8 + $0x84] ss:$8 sps:$4 sm:$0xff]   ;;  %v1919_v24 = vld [vmem:[#allocation8 + $0x220] ss:$8 sps:$4 sm:$0xff]   ;;  %v1937_v36 = vld [vmem:[#allocation8 + $0x250] ss:$8 sps:$4 sm:$0xff]  }
  0x71   :  { %374 = vmatprep.subr.bf16.mxu0 %v1663_v37  ;;  %1292 = vmatpush1.bf16.msra.mxu1 %v1880_v51  ;;  %v1904_v25 = vld [vmem:[#allocation8 + $0x80] ss:$8 sps:$4 sm:$0xff]   ;;  %v1933_v30 = vld [vmem:[#allocation8 + $0x244] ss:$8 sps:$4 sm:$0xff]   ;;  %v1922_v37 = vld [vmem:[#allocation8 + $0xb0] ss:$8 sps:$4 sm:$0xff]  }
  0x72   :  { %1293 = vmatprep.subr.bf16.mxu1 %v1885_v53  ;;  %v1918_v31 = vld [vmem:[#allocation8 + $0xa4] ss:$8 sps:$4 sm:$0xff]   ;;  %v1931_v32 = vld [vmem:[#allocation8 + $0x240] ss:$8 sps:$4 sm:$0xff]   ;;  %v1961_v53 = vld [vmem:[#allocation8 + $0x290] ss:$8 sps:$4 sm:$0xff]  }
  0x73   :  { %v1916_v33 = vld [vmem:[#allocation8 + $0xa0] ss:$8 sps:$4 sm:$0xff]   ;;  %v1930_v38 = vld [vmem:[#allocation8 + $0xc4] ss:$8 sps:$4 sm:$0xff]   ;;  %v1973_v58 = vld [vmem:[#allocation8 + $0x2b0] ss:$8 sps:$4 sm:$0xff]  }
  0x74   :  { %375 = vmatpush1.bf16.msra.mxu0 %v1662_v42  ;;  %v1928_v39 = vld [vmem:[#allocation8 + $0xc0] ss:$8 sps:$4 sm:$0xff]   ;;  %v1942_v42 = vld [vmem:[#allocation8 + $0xe4] ss:$8 sps:$4 sm:$0xff]   ;;  %v1987_v62 = vld [vmem:[#allocation8 + $0x2d4] ss:$8 sps:$4 sm:$0xff]  }
  0x75   :  { %376 = vmatprep.subr.bf16.mxu0 %v1671_v43  ;;  %1294 = vmatpush1.bf16.msra.mxu1 %v1883_v57  ;;  %v1945_v43 = vld [vmem:[#allocation8 + $0x264] ss:$8 sps:$4 sm:$0xff]   ;;  %v1940_v44 = vld [vmem:[#allocation8 + $0xe0] ss:$8 sps:$4 sm:$0xff]   ;;  %v1975_v57 = vld [vmem:[#allocation8 + $0x2b4] ss:$8 sps:$4 sm:$0xff]  }
  0x76   :  { %1295 = vmatprep.subr.bf16.mxu1 %v1888_v59  ;;  %v1943_v45 = vld [vmem:[#allocation8 + $0x260] ss:$8 sps:$4 sm:$0xff]   ;;  %v1954_v50 = vld [vmem:[#allocation8 + $0x104] ss:$8 sps:$4 sm:$0xff]  }
  0x77   :  { %v1957_v51 = vld [vmem:[#allocation8 + $0x284] ss:$8 sps:$4 sm:$0xff]   ;;  %v1955_v52 = vld [vmem:[#allocation8 + $0x280] ss:$8 sps:$4 sm:$0xff]  }
  0x78   :  { %377 = vmatpush1.bf16.msra.mxu0 %v1670_v48  ;;  %v1946_v48 = vld [vmem:[#allocation8 + $0xf0] ss:$8 sps:$4 sm:$0xff]   ;;  %v1967_v56 = vld [vmem:[#allocation8 + $0x2a0] ss:$8 sps:$4 sm:$0xff]   ;;  %v1981_v59 = vld [vmem:[#allocation8 + $0x2c4] ss:$8 sps:$4 sm:$0xff]  }
  0x79   :  { %378 = vmatprep.subr.bf16.mxu0 %v1679_v49  ;;  %1296 = vmatpush1.bf16.msra.mxu1 %v1886_v63  ;;  %v1949_v49 = vld [vmem:[#allocation8 + $0x270] ss:$8 sps:$4 sm:$0xff]   ;;  %v1993_v63 = vld [vmem:[#allocation8 + $0x2e4] ss:$8 sps:$4 sm:$0xff]   ;;  %v1991_v1 = vld [vmem:[#allocation8 + $0x2e0] ss:$8 sps:$4 sm:$0xff]  }
  0x7a   :  { %1297 = vmatprep.subr.bf16.mxu1 %v1891_v2  ;;  %v1999_v2 = vld [vmem:[#allocation8 + $0x2f4] ss:$8 sps:$4 sm:$0xff]   ;;  %v2005_v4 = vld [vmem:[#allocation8 + $0x304] ss:$8 sps:$4 sm:$0xff]  }
  0x7c   :  { %379 = vmatpush1.bf16.msra.mxu0 %v1678_v54  ;;  %v1963_v54 = vld [vmem:[#allocation8 + $0x294] ss:$8 sps:$4 sm:$0xff]  }
  0x7d   :  { %413 = vmatprep.subr.bf16.mxu0 %v1657_v55  ;;  %1298 = vmatpush1.bf16.msra.mxu1 %v1889_v7  ;;  %v1969_v55 = vld [vmem:[#allocation8 + $0x2a4] ss:$8 sps:$4 sm:$0xff]  }
  0x7e   :  { %1299 = vmatprep.subr.bf16.mxu1 %v1894_v8  ;;  %v2358_v8 = vld [vmem:[#allocation7] sm:$0xff] }
  0x7f   :  { %1685 = vmatmul.mubr.msk.bf16.vlgmr.msra.gmra.mrb[4].mxu0 %vm327_vm0, %v2343_v35 }
  0x80   :  { %414 = vmatpush1.bf16.msra.mxu0 %v1656_v60  ;;  %445 = vmatprep.mubr.bf16.mxu0 %v2239_v0  ;;  %v1900_v0 = vld [vmem:[#allocation8 + $0x64] ss:$8 sps:$4 sm:$0xff]   ;;  %v1979_v60 = vld [vmem:[#allocation8 + $0x2c0] ss:$8 sps:$4 sm:$0xff]  }
  0x81   :  { %415 = vmatprep.subr.bf16.mxu0 %v1665_v61  ;;  %1300 = vmatpush1.bf16.msra.mxu1 %v1892_v9  ;;  %v1985_v61 = vld [vmem:[#allocation8 + $0x2d0] ss:$8 sps:$4 sm:$0xff]  }
  0x82   :  { %1301 = vmatprep.subr.bf16.mxu1 %v1897_v11 }
  0x84   :  { %416 = vmatpush1.bf16.msra.mxu0 %v1664_v3  ;;  %v1997_v3 = vld [vmem:[#allocation8 + $0x2f0] ss:$8 sps:$4 sm:$0xff]  }
  0x85   :  { %417 = vmatprep.subr.bf16.mxu0 %v1673_v5  ;;  %1302 = vmatpush1.bf16.msra.mxu1 %v1895_v13  ;;  %v127_v5 = vlaneseq }
  0x86   :  { %1303 = vmatprep.subr.bf16.mxu1 %v1900_v0 }
  0x87   :  { %v2355_v6 = vshrl.u32 %v127_v5, 7  ;;  %v2003_v5 = vld [vmem:[#allocation8 + $0x300] ss:$8 sps:$4 sm:$0xff]  }
  0x88   :  { %418 = vmatpush1.bf16.msra.mxu0 %v1672_v10 }
  0x89   :  { %419 = vmatprep.subr.bf16.mxu0 %v1681_v12  ;;  %1304 = vmatpush1.bf16.msra.mxu1 %v1898_v17  ;;  %v129_v7 = vsub.s32 0, %v2355_v6  ;;  %v133_v9 = vsub.s32 1, %v2355_v6 }
  0x8a   :  { %1305 = vmatprep.subr.bf16.mxu1 %v1903_v19 }
  0x8b   :  { %v130_v10 = vrot.slane %v2358_v8, %v129_v7  ;;  %v134_v11 = vrot.slane %v2358_v8, %v133_v9 }
  0x8c   :  { %420 = vmatpush1.bf16.msra.mxu0 %v1680_v15 }
  0x8d   :  { %1373 = vmatprep.subr.bf16.mxu0 %v1909_v14  ;;  %1306 = vmatpush1.bf16.msra.mxu1 %v1901_v21  ;;  %v1952_v21 = vld [vmem:[#allocation8 + $0x100] ss:$8 sps:$4 sm:$0xff]  }
  0x8e   :  { %1307 = vmatprep.subr.bf16.mxu1 %v1906_v23 }
  0x8f   :  { %1686 = vmatmul.mubr.msk.bf16.vlgmr.msra.gmra.mrb[8].mxu0 %vm327_vm0, %v2343_v35  ;;  %v1924_v35 = vld [vmem:[#allocation8 + $0xb4] ss:$8 sps:$4 sm:$0xff]  }
  0x90   :  { %1374 = vmatpush1.bf16.msra.mxu0 %v1907_v16 }
  0x91   :  { %1375 = vmatprep.subr.bf16.mxu0 %v1915_v18  ;;  %1308 = vmatpush1.bf16.msra.mxu1 %v1904_v25  ;;  %v141_v25 = vsub.s32 3, %v2355_v6 }
  0x92   :  { %1309 = vmatprep.subr.bf16.mxu1 %v1912_v27  ;;  %v1966_v27 = vld [vmem:[#allocation8 + $0x124] ss:$8 sps:$4 sm:$0xff]  }
  0x94   :  { %1376 = vmatpush1.bf16.msra.mxu0 %v1913_v20 }
  0x95   :  { %1377 = vmatprep.subr.bf16.mxu0 %v1921_v22  ;;  %1310 = vmatpush1.bf16.msra.mxu1 %v1910_v29  ;;  %v1960_v22 = vld [vmem:[#allocation8 + $0x114] ss:$8 sps:$4 sm:$0xff]  }
  0x96   :  { %1311 = vmatprep.subr.bf16.mxu1 %v1918_v31  ;;  %v142_v31 = vrot.slane %v2358_v8, %v141_v25  ;;  %v2029_v25 = vld [vmem:[#allocation8 + $0x344] ss:$8 sps:$4 sm:$0xff]  }
  0x98   :  { %1378 = vmatpush1.bf16.msra.mxu0 %v1919_v24  ;;  %v1958_v24 = vld [vmem:[#allocation8 + $0x110] ss:$8 sps:$4 sm:$0xff]  }
  0x99   :  { %1379 = vmatprep.subr.bf16.mxu0 %v1927_v26  ;;  %1312 = vmatpush1.bf16.msra.mxu1 %v1916_v33 }
  0x9a   :  { %1313 = vmatprep.subr.bf16.mxu1 %v1924_v35 }
  0x9c   :  { %1380 = vmatpush1.bf16.msra.mxu0 %v1925_v28 }
  0x9d   :  { %1381 = vmatprep.subr.bf16.mxu0 %v1933_v30  ;;  %1314 = vmatpush1.bf16.msra.mxu1 %v1922_v37  ;;  %v1964_v30 = vld [vmem:[#allocation8 + $0x120] ss:$8 sps:$4 sm:$0xff]   ;;  %v1970_v37 = vld [vmem:[#allocation8 + $0x130] ss:$8 sps:$4 sm:$0xff]  }
  0x9e   :  { %1315 = vmatprep.subr.bf16.mxu1 %v1930_v38 }
  0xa0   :  { %1382 = vmatpush1.bf16.msra.mxu0 %v1931_v32  ;;  %v1972_v32 = vld [vmem:[#allocation8 + $0x134] ss:$8 sps:$4 sm:$0xff]  }
  0xa1   :  { %1383 = vmatprep.subr.bf16.mxu0 %v1939_v34  ;;  %1316 = vmatpush1.bf16.msra.mxu1 %v1928_v39  ;;  %v1978_v39 = vld [vmem:[#allocation8 + $0x144] ss:$8 sps:$4 sm:$0xff]  }
  0xa2   :  { %1317 = vmatprep.subr.bf16.mxu1 %v1936_v40 }
  0xa4   :  { %1384 = vmatpush1.bf16.msra.mxu0 %v1937_v36 }
  0xa5   :  { %1318 = vmatpush1.bf16.msra.mxu1 %v1934_v41  ;;  %1385 = vmatprep.subr.bf16.mxu0 %v1945_v43  ;;  %v1984_v43 = vld [vmem:[#allocation8 + $0x154] ss:$8 sps:$4 sm:$0xff]  }
  0xa6   :  { %1319 = vmatprep.subr.bf16.mxu1 %v1942_v42  ;;  %v1976_v42 = vld [vmem:[#allocation8 + $0x140] ss:$8 sps:$4 sm:$0xff]  }
  0xa8   :  { %1386 = vmatpush1.bf16.msra.mxu0 %v1943_v45  ;;  %v145_v45 = vsub.s32 4, %v2355_v6 }
  0xa9   :  { %1320 = vmatpush1.bf16.msra.mxu1 %v1940_v44  ;;  %1387 = vmatprep.subr.bf16.mxu0 %v1951_v47  ;;  %v157_v44 = vsub.s32 7, %v2355_v6  ;;  %v149_v47 = vsub.s32 5, %v2355_v6 }
  0xaa   :  { %1321 = vmatprep.subr.bf16.mxu1 %v1948_v46  ;;  %v1982_v46 = vld [vmem:[#allocation8 + $0x150] ss:$8 sps:$4 sm:$0xff]  }
  0xac   :  { %1388 = vmatpush1.bf16.msra.mxu0 %v1949_v49  ;;  %v158_v49 = vrot.slane %v2358_v8, %v157_v44 }
  0xad   :  { %1322 = vmatpush1.bf16.msra.mxu1 %v1946_v48  ;;  %1389 = vmatprep.subr.bf16.mxu0 %v1957_v51  ;;  %v1990_v48 = vld [vmem:[#allocation8 + $0x164] ss:$8 sps:$4 sm:$0xff]   ;;  %v1988_v51 = vld [vmem:[#allocation8 + $0x160] ss:$8 sps:$4 sm:$0xff]  }
  0xae   :  { %1332 = vmatprep.subr.bf16.mxu1 %v1954_v50  ;;  %v146_v50 = vrot.slane %v2358_v8, %v145_v45  ;;  %v2050_v45 = vld [vmem:[#allocation8 + $0x384] ss:$8 sps:$4 sm:$0xff]  }
  0xb0   :  { %1390 = vmatpush1.bf16.msra.mxu0 %v1955_v52  ;;  %v150_v52 = vrot.slane %v2358_v8, %v149_v47 }
  0xb1   :  { %1391 = vmatprep.subr.bf16.mxu0 %v1963_v54 }
  0xb4   :  { %1392 = vmatpush1.bf16.msra.mxu0 %v1961_v53  ;;  %v1996_v53 = vld [vmem:[#allocation8 + $0x174] ss:$8 sps:$4 sm:$0xff]  }
  0xb5   :  { %1393 = vmatprep.subr.bf16.mxu0 %v1969_v55 }
  0xb8   :  { %1394 = vmatpush1.bf16.msra.mxu0 %v1967_v56 }
  0xb9   :  { %1395 = vmatprep.subr.bf16.mxu0 %v1975_v57 }
  0xbc   :  { %1396 = vmatpush1.bf16.msra.mxu0 %v1973_v58 }
  0xbd   :  { %1397 = vmatprep.subr.bf16.mxu0 %v1981_v59 }
  0xc0   :  { %1398 = vmatpush1.bf16.msra.mxu0 %v1979_v60  ;;  %v1994_v60 = vld [vmem:[#allocation8 + $0x170] ss:$8 sps:$4 sm:$0xff]  }
  0xc1   :  { %1399 = vmatprep.subr.bf16.mxu0 %v1987_v62 }
  0xc4   :  { %1400 = vmatpush1.bf16.msra.mxu0 %v1985_v61 }
  0xc5   :  { %1401 = vmatprep.subr.bf16.mxu0 %v1993_v63  ;;  %v2002_v63 = vld [vmem:[#allocation8 + $0x184] ss:$8 sps:$4 sm:$0xff]  }
  0xc8   :  { %1402 = vmatpush1.bf16.msra.mxu0 %v1991_v1 }
  0xc9   :  { %1403 = vmatprep.subr.bf16.mxu0 %v1999_v2 }
  0xcc   :  { %1404 = vmatpush1.bf16.msra.mxu0 %v1997_v3 }
  0xcd   :  { %1414 = vmatprep.subr.bf16.mxu0 %v2005_v4  ;;  %v2000_v4 = vld [vmem:[#allocation8 + $0x180] ss:$8 sps:$4 sm:$0xff]  }
 0x142   :  { %v365_v12 = vpop.f32.mrb[0].mxu0  ;;  %v2367_v23 = vpop.f32.mrb[0].mxu1 }
 0x143   :  { %v366_v13 = vadd.f32 %v365_v12, %v130_v10  ;;  %v367_v14 = vpop.f32.mrb[1].mxu0  ;;  %v490_v26 = vpop.f32.mrb[1].mxu1  ;;  %v2011_v12 = vld [vmem:[#allocation8 + $0x314] ss:$8 sps:$4 sm:$0xff]  }
 0x144   :  { %v368_v15 = vadd.f32 %v367_v14, %v134_v11  ;;  %v369_v0 = vpop.f32.mrb[2].mxu0  ;;  %v492_v28 = vpop.f32.mrb[2].mxu1  ;;  %v491_v55 = vadd.f32 %v490_v26, %v158_v49  ;;  %v2008_v11 = vld [vmem:[#allocation8 + $0x194] ss:$8 sps:$4 sm:$0xff]   ;;  %v2006_v14 = vld [vmem:[#allocation8 + $0x190] ss:$8 sps:$4 sm:$0xff]  }
 0x145   :  { %v495_v16 = vmax.f32 %v366_v13, 0.0  ;;  %v370_v17 = vpop.f32.mrb[3].mxu0  ;;  %v493_v29 = vpop.f32.mrb[3].mxu1  ;;  %v2014_v0 = vld [vmem:[#allocation8 + $0x1a4] ss:$8 sps:$4 sm:$0xff]   ;;  %v137_v28 = vsub.s32 2, %v2355_v6 }
 0x146   :  { %v496_v18 = vmax.f32 %v368_v15, 0.0  ;;  %v502_v2 = vmax.f32 %v491_v55, 0.0  ;;  %v2009_v15 = vld [vmem:[#allocation8 + $0x310] ss:$8 sps:$4 sm:$0xff]   ;;  %v2012_v17 = vld [vmem:[#allocation8 + $0x1a0] ss:$8 sps:$4 sm:$0xff]  }
 0x147   :  { %v503_v19 = vpack.c.bf16 %v495_v16, %v495_v16  ;;  %v2017_v16 = vld [vmem:[#allocation8 + $0x324] ss:$8 sps:$4 sm:$0xff]   ;;  %v2024_v26 = vld [vmem:[#allocation8 + $0x1c0] ss:$8 sps:$4 sm:$0xff]   ;;  %v2032_v29 = vld [vmem:[#allocation8 + $0x1d4] ss:$8 sps:$4 sm:$0xff]  }
 0x148   :  { %v504_v20 = vpack.c.bf16 %v496_v18, %v496_v18  ;;  %v510_v13 = vpack.c.bf16 %v502_v2, %v502_v2  ;;  %v2015_v18 = vld [vmem:[#allocation8 + $0x320] ss:$8 sps:$4 sm:$0xff]   ;;  %v2056_v49 = vld [vmem:[#allocation8 + $0x3a4] ss:$8 sps:$4 sm:$0xff]   ;;  %v153_v55 = vsub.s32 6, %v2355_v6 }
 0x149   :  { %v1816_v6 = vld [vmem:[%s2413_s6] ss:$0 sm:$0xff] }
 0x14a   :  { %1323 = vmatprep.mubr.bf16.mxu1 %v504_v20  ;;  %v2023_v20 = vld [vmem:[#allocation8 + $0x334] ss:$8 sps:$4 sm:$0xff]  }
 0x14b   :  { %1324 = vmatmul.mubr.bf16.vlgmr.msra.gmra.mrb[4].mxu1 %v503_v19  ;;  %v2020_v19 = vld [vmem:[#allocation8 + $0x1b4] ss:$8 sps:$4 sm:$0xff]  }
 0x14c   :  { %1333 = vmatpush1.bf16.msra.mxu1 %v1952_v21  ;;  %v2018_v21 = vld [vmem:[#allocation8 + $0x1b0] ss:$8 sps:$4 sm:$0xff]  }
 0x14d   :  { %1334 = vmatprep.subr.bf16.mxu1 %v1960_v22  ;;  %v2021_v22 = vld [vmem:[#allocation8 + $0x330] ss:$8 sps:$4 sm:$0xff]  }
 0x150   :  { %1335 = vmatpush1.bf16.msra.mxu1 %v1958_v24  ;;  %v2026_v24 = vld [vmem:[#allocation8 + $0x1c4] ss:$8 sps:$4 sm:$0xff]  }
 0x151   :  { %1336 = vmatprep.subr.bf16.mxu1 %v1966_v27  ;;  %v2027_v27 = vld [vmem:[#allocation8 + $0x340] ss:$8 sps:$4 sm:$0xff]  }
 0x152   :  { %v2371_v33 = vpop.f32.mrb[4].mxu0 }
 0x153   :  { %v408_v34 = vpop.f32.mrb[5].mxu0 }
 0x154   :  { %v409_v35 = vadd.f32 %v408_v34, %v142_v31  ;;  %1337 = vmatpush1.bf16.msra.mxu1 %v1964_v30  ;;  %v410_v36 = vpop.f32.mrb[6].mxu0  ;;  %v2035_v30 = vld [vmem:[#allocation8 + $0x354] ss:$8 sps:$4 sm:$0xff]   ;;  %v2030_v31 = vld [vmem:[#allocation8 + $0x1d0] ss:$8 sps:$4 sm:$0xff]   ;;  %v138_v34 = vrot.slane %v2358_v8, %v137_v28 }
 0x155   :  { %v411_v38 = vpop.f32.mrb[7].mxu0  ;;  %1338 = vmatprep.subr.bf16.mxu1 %v1972_v32  ;;  %v2033_v32 = vld [vmem:[#allocation8 + $0x350] ss:$8 sps:$4 sm:$0xff]   ;;  %v2041_v36 = vld [vmem:[#allocation8 + $0x364] ss:$8 sps:$4 sm:$0xff]  }
 0x156   :  { %v498_v40 = vmax.f32 %v409_v35, 0.0  ;;  %v2038_v35 = vld [vmem:[#allocation8 + $0x1e4] ss:$8 sps:$4 sm:$0xff]   ;;  %v2039_v38 = vld [vmem:[#allocation8 + $0x360] ss:$8 sps:$4 sm:$0xff]  }
 0x158   :  { %v506_v41 = vpack.c.bf16 %v498_v40, %v498_v40  ;;  %1339 = vmatpush1.bf16.msra.mxu1 %v1970_v37  ;;  %v2036_v37 = vld [vmem:[#allocation8 + $0x1e0] ss:$8 sps:$4 sm:$0xff]   ;;  %v2044_v40 = vld [vmem:[#allocation8 + $0x1f4] ss:$8 sps:$4 sm:$0xff]  }
 0x159   :  { %1340 = vmatprep.subr.bf16.mxu1 %v1978_v39  ;;  %v407_v39 = vadd.f32 %v2371_v33, %v138_v34  ;;  %v2051_v33 = vld [vmem:[#allocation8 + $0x390] ss:$8 sps:$4 sm:$0xff]  }
 0x15a   :  { %1364 = vmatprep.mubr.bf16.mxu1 %v506_v41  ;;  %v2047_v41 = vld [vmem:[#allocation8 + $0x374] ss:$8 sps:$4 sm:$0xff]  }
 0x15b   :  { %v497_v44 = vmax.f32 %v407_v39, 0.0 }
 0x15c   :  { %1341 = vmatpush1.bf16.msra.mxu1 %v1976_v42  ;;  %v2042_v42 = vld [vmem:[#allocation8 + $0x1f0] ss:$8 sps:$4 sm:$0xff]  }
 0x15d   :  { %1342 = vmatprep.subr.bf16.mxu1 %v1984_v43  ;;  %v2045_v43 = vld [vmem:[#allocation8 + $0x370] ss:$8 sps:$4 sm:$0xff]   ;;  %v505_v47 = vpack.c.bf16 %v497_v44, %v497_v44 }
 0x160   :  { %1343 = vmatpush1.bf16.msra.mxu1 %v1982_v46  ;;  %v2048_v46 = vld [vmem:[#allocation8 + $0x380] ss:$8 sps:$4 sm:$0xff]  }
 0x161   :  { %1344 = vmatprep.subr.bf16.mxu1 %v1990_v48  ;;  %v2053_v48 = vld [vmem:[#allocation8 + $0x394] ss:$8 sps:$4 sm:$0xff]  }
 0x162   :  { %v447_v54 = vpop.f32.mrb[8].mxu0 }
 0x163   :  { %v448_v56 = vadd.f32 %v447_v54, %v146_v50  ;;  %v449_v57 = vpop.f32.mrb[9].mxu0  ;;  %v2054_v50 = vld [vmem:[#allocation8 + $0x3a0] ss:$8 sps:$4 sm:$0xff]  }
 0x164   :  { %v450_v58 = vadd.f32 %v449_v57, %v150_v52  ;;  %1345 = vmatpush1.bf16.msra.mxu1 %v1988_v51  ;;  %v451_v59 = vpop.f32.mrb[10].mxu0  ;;  %v2059_v51 = vld [vmem:[#allocation8 + $0x3b4] ss:$8 sps:$4 sm:$0xff]   ;;  %v2057_v52 = vld [vmem:[#allocation8 + $0x3b0] ss:$8 sps:$4 sm:$0xff]  }
 0x165   :  { %v499_v61 = vmax.f32 %v448_v56, 0.0  ;;  %v452_v62 = vpop.f32.mrb[11].mxu0  ;;  %1346 = vmatprep.subr.bf16.mxu1 %v1996_v53  ;;  %v2062_v53 = vld [vmem:[#allocation8 + $0x3c4] ss:$8 sps:$4 sm:$0xff]   ;;  %v2060_v54 = vld [vmem:[#allocation8 + $0x3c0] ss:$8 sps:$4 sm:$0xff]  }
 0x166   :  { %v500_v1 = vmax.f32 %v450_v58, 0.0  ;;  %v2065_v56 = vld [vmem:[#allocation8 + $0x3d4] ss:$8 sps:$4 sm:$0xff]   ;;  %v2063_v57 = vld [vmem:[#allocation8 + $0x3d0] ss:$8 sps:$4 sm:$0xff]   ;;  %v154_v58 = vrot.slane %v2358_v8, %v153_v55  ;;  %v2075_v8 = vld [vmem:[#allocation10 + $0x8] sm:$0xff]  }
 0x167   :  { %v507_v10 = vpack.c.bf16 %v499_v61, %v499_v61  ;;  %v2068_v59 = vld [vmem:[#allocation8 + $0x3e4] ss:$8 sps:$4 sm:$0xff]   ;;  %v2071_v62 = vld [vmem:[#allocation8 + $0x3f4] ss:$8 sps:$4 sm:$0xff]  }
 0x168   :  { %v508_v3 = vpack.c.bf16 %v500_v1, %v500_v1  ;;  %1347 = vmatpush1.bf16.msra.mxu1 %v1994_v60  ;;  %v2066_v60 = vld [vmem:[#allocation8 + $0x3e0] ss:$8 sps:$4 sm:$0xff]   ;;  %v489_v61 = vadd.f32 %v2367_v23, %v154_v58  ;;  %v2078_v23 = vld [vmem:[#allocation10 + $0x58] sm:$0xff]  }
 0x169   :  { %1348 = vmatprep.subr.bf16.mxu1 %v2002_v63  ;;  %v2069_v63 = vld [vmem:[#allocation8 + $0x3f0] ss:$8 sps:$4 sm:$0xff]  }
 0x16a   :  { %1405 = vmatprep.mubr.bf16.mxu0 %v508_v3  ;;  %v501_v1 = vmax.f32 %v489_v61, 0.0  ;;  %v2072_v3 = vld [vmem:[#allocation10 + $0x40] sm:$0xff]  }
 0x16b   :  { %1406 = vmatmul.mubr.bf16.vlgmr.msra.gmra.mrb[12].mxu0 %v507_v10  ;;  %v2076_v10 = vld [vmem:[#allocation10 + $0x50] sm:$0xff]  }
 0x16c   :  { %1349 = vmatpush1.bf16.msra.mxu1 %v2000_v4  ;;  %1415 = vmatpush1.bf16.msra.mxu0 %v2003_v5  ;;  %v509_v2 = vpack.c.bf16 %v501_v1, %v501_v1  ;;  %v2073_v4 = vld [vmem:[#allocation10] sm:$0xff]   ;;  %v2074_v5 = vld [vmem:[#allocation10 + $0x48] sm:$0xff]  }
 0x16d   :  { %1350 = vmatprep.subr.bf16.mxu1 %v2008_v11  ;;  %1416 = vmatprep.subr.bf16.mxu0 %v2011_v12  ;;  %v2077_v11 = vld [vmem:[#allocation10 + $0x10] sm:$0xff]   ;;  %v2079_v12 = vld [vmem:[#allocation10 + $0x18] sm:$0xff]  }
 0x16e   :  { %1446 = vmatprep.mubr.bf16.mxu0 %v510_v13  ;;  %v2080_v13 = vld [vmem:[#allocation10 + $0x60] sm:$0xff]  }
 0x170   :  { %1351 = vmatpush1.bf16.msra.mxu1 %v2006_v14  ;;  %1417 = vmatpush1.bf16.msra.mxu0 %v2009_v15  ;;  %v2081_v14 = vld [vmem:[#allocation10 + $0x20] sm:$0xff]   ;;  %v2082_v15 = vld [vmem:[#allocation10 + $0x68] sm:$0xff]  }
 0x171   :  { %1352 = vmatprep.subr.bf16.mxu1 %v2014_v0  ;;  %1418 = vmatprep.subr.bf16.mxu0 %v2017_v16  ;;  %v2083_v0 = vld [vmem:[#allocation10 + $0x28] sm:$0xff]   ;;  %v2084_v16 = vld [vmem:[#allocation10 + $0x70] sm:$0xff]  }
 0x174   :  { %1353 = vmatpush1.bf16.msra.mxu1 %v2012_v17  ;;  %1419 = vmatpush1.bf16.msra.mxu0 %v2015_v18  ;;  %v2085_v17 = vld [vmem:[#allocation10 + $0x30] sm:$0xff]   ;;  %v2086_v18 = vld [vmem:[#allocation10 + $0x78] sm:$0xff]  }
 0x175   :  { %1354 = vmatprep.subr.bf16.mxu1 %v2020_v19  ;;  %1420 = vmatprep.subr.bf16.mxu0 %v2023_v20  ;;  %v2087_v19 = vld [vmem:[#allocation10 + $0x38] sm:$0xff]  }
 0x178   :  { %1355 = vmatpush1.bf16.msra.mxu1 %v2018_v21  ;;  %1421 = vmatpush1.bf16.msra.mxu0 %v2021_v22 }
 0x179   :  { %1356 = vmatprep.subr.bf16.mxu1 %v2026_v24  ;;  %1422 = vmatprep.subr.bf16.mxu0 %v2029_v25  ;;  %v639_v25 = vld [vmem:[%s2411_s4] sm:$0x3] }
 0x17c   :  { %1357 = vmatpush1.bf16.msra.mxu1 %v2024_v26  ;;  %1423 = vmatpush1.bf16.msra.mxu0 %v2027_v27  ;;  %v644_v26 = vrot.slane %v639_v25, %v129_v7  ;;  %v648_v27 = vrot.slane %v639_v25, %v133_v9 }
 0x17d   :  { %1358 = vmatprep.subr.bf16.mxu1 %v2032_v29  ;;  %1424 = vmatprep.subr.bf16.mxu0 %v2035_v30 }
 0x180   :  { %1359 = vmatpush1.bf16.msra.mxu1 %v2030_v31  ;;  %1425 = vmatpush1.bf16.msra.mxu0 %v2033_v32 }
 0x181   :  { %1360 = vmatprep.subr.bf16.mxu1 %v2038_v35  ;;  %1426 = vmatprep.subr.bf16.mxu0 %v2041_v36 }
 0x184   :  { %1361 = vmatpush1.bf16.msra.mxu1 %v2036_v37  ;;  %1427 = vmatpush1.bf16.msra.mxu0 %v2039_v38 }
 0x185   :  { %1362 = vmatprep.subr.bf16.mxu1 %v2044_v40  ;;  %1428 = vmatprep.subr.bf16.mxu0 %v2047_v41 }
 0x188   :  { %1363 = vmatpush1.bf16.msra.mxu1 %v2042_v42  ;;  %1429 = vmatpush1.bf16.msra.mxu0 %v2045_v43 }
 0x189   :  { %1430 = vmatprep.subr.bf16.mxu0 %v2050_v45  ;;  %1833 = vmatprep.subr.bf16.mxu1 %v2072_v3 }
 0x18b   :  { %1365 = vmatmul.mubr.bf16.vlgmr.msra.gmra.mrb[4].mxu1 %v505_v47 }
 0x18c   :  { %1431 = vmatpush1.bf16.msra.mxu0 %v2048_v46  ;;  %1834 = vmatpush3.bf16.msra.mxu1 %v2073_v4 }
 0x18d   :  { %1432 = vmatprep.subr.bf16.mxu0 %v2053_v48  ;;  %1835 = vmatprep.subr.bf16.mxu1 %v2074_v5 }
 0x190   :  { %1433 = vmatpush1.bf16.msra.mxu0 %v2051_v33  ;;  %1836 = vmatpush3.bf16.msra.mxu1 %v2075_v8 }
 0x191   :  { %1434 = vmatprep.subr.bf16.mxu0 %v2056_v49  ;;  %1837 = vmatprep.subr.bf16.mxu1 %v2076_v10 }
 0x194   :  { %1435 = vmatpush1.bf16.msra.mxu0 %v2054_v50  ;;  %1838 = vmatpush3.bf16.msra.mxu1 %v2077_v11 }
 0x195   :  { %1436 = vmatprep.subr.bf16.mxu0 %v2059_v51  ;;  %1839 = vmatprep.subr.bf16.mxu1 %v2078_v23 }
 0x198   :  { %1437 = vmatpush1.bf16.msra.mxu0 %v2057_v52  ;;  %1840 = vmatpush3.bf16.msra.mxu1 %v2079_v12 }
 0x199   :  { %1438 = vmatprep.subr.bf16.mxu0 %v2062_v53  ;;  %1841 = vmatprep.subr.bf16.mxu1 %v2080_v13 }
 0x19c   :  { %1439 = vmatpush1.bf16.msra.mxu0 %v2060_v54  ;;  %1842 = vmatpush3.bf16.msra.mxu1 %v2081_v14 }
 0x19d   :  { %1440 = vmatprep.subr.bf16.mxu0 %v2065_v56  ;;  %1843 = vmatprep.subr.bf16.mxu1 %v2082_v15 }
 0x1a0   :  { %1441 = vmatpush1.bf16.msra.mxu0 %v2063_v57  ;;  %1844 = vmatpush3.bf16.msra.mxu1 %v2083_v0 }
 0x1a1   :  { %1442 = vmatprep.subr.bf16.mxu0 %v2068_v59  ;;  %1845 = vmatprep.subr.bf16.mxu1 %v2084_v16 }
 0x1a4   :  { %1443 = vmatpush1.bf16.msra.mxu0 %v2066_v60  ;;  %1846 = vmatpush3.bf16.msra.mxu1 %v2085_v17 }
 0x1a5   :  { %1444 = vmatprep.subr.bf16.mxu0 %v2071_v62  ;;  %1847 = vmatprep.subr.bf16.mxu1 %v2086_v18 }
 0x1a8   :  { %1445 = vmatpush1.bf16.msra.mxu0 %v2069_v63  ;;  %1848 = vmatpush3.bf16.msra.mxu1 %v2087_v19 }
 0x1ab   :  { %1447 = vmatmul.mubr.bf16.vlgmr.msra.gmra.mrb[12].mxu0 %v509_v2 }
 0x25e   :  { %v1366_v20 = vpop.f32.mrb[4].mxu1 }
 0x25f   :  { %v1368_v21 = vpop.f32.mrb[5].mxu1  ;;  %v1855_v28 = vadd.f32 %v1366_v20, %v644_v26 }
 0x260   :  { %v1370_v22 = vpop.f32.mrb[6].mxu1  ;;  %v1857_v29 = vadd.f32 %v1368_v21, %v648_v27 }
 0x261   :  { %v1371_v24 = vpop.f32.mrb[7].mxu1 }
 0x27e   :  { %v1448_v30 = vpop.f32.mrb[12].mxu0 }
 0x27f   :  { %v1856_v31 = vadd.f32 %v1855_v28, %v1448_v30  ;;  %v1450_v32 = vpop.f32.mrb[13].mxu0 }
 0x280   :  { %v1858_v34 = vadd.f32 %v1857_v29, %v1450_v32  ;;  %v1452_v35 = vpop.f32.mrb[14].mxu0 }
 0x281   :  { %v1455_v36 = vmax.f32 %v1856_v31, 0.0  ;;  %v1453_v37 = vpop.f32.mrb[15].mxu0 }
 0x282   :  { %v1456_v38 = vmax.f32 %v1858_v34, 0.0 }
 0x283   :  { %v1457_v40 = vpack.c.bf16 %v1455_v36, %v1455_v36 }
 0x284   :  { %v1458_v39 = vpack.c.bf16 %v1456_v38, %v1456_v38 }
 0x286   :  { %1626 = vmatprep.mubr.bf16.mxu1 %v1458_v39 }
 0x287   :  { %1627 = vmatmul.mubr.bf16.vlgmr.msra.gmra.mrb[8].mxu1 %v1457_v40 }
 0x35a   :  { %v1849_v41 = vpop.f32.mrb[8].mxu1 }
 0x35b   :  { %v1850_v7 = vpop.f32.mrb[9].mxu1 }
 0x35c   :  { %v1851_v9 = vadd.f32 %v1850_v7, %v1849_v41  ;;  %v1852_v42 = vpop.f32.mrb[10].mxu1 }
 0x35d   :  { %v1853_v43 = vpop.f32.mrb[11].mxu1 }
 0x35e   :  { %v1629_v44 = vadd.f32 %v1851_v9, %v1816_v6 }
 0x360   :  { %1634 = vst [vmem:[#allocation11] sm:$0xff] %v1629_v44 }
 0x361   :  { %2209 = shalt.err (!%p2206_p2)
}
 0x362   :  { %s2210_s6 = scalar_lea.hbm %s2414_s7, 128 }
 0x363   :  { %p2211_p3 = scmp.ne.s32.totalorder %s2414_s7, %s2210_s6  ;;  %p2214_p4 = scmp.lt.u32.totalorder %s2210_s6, %s2414_s7 }
 0x365   :  { %p2216_p5 = pnand %p2214_p4, %p2211_p3 }
 0x367   :  { %2219 = shalt.err (!%p2216_p5)
}
 0x368   :  { %1644 = dma.vmem_to_hbm [thread:$0]  %s1642_s18, 128, %s2414_s7, [#allocation4]  }
 0x369   :  { %2226 = dma.done.wait [#allocation4], 128  }
 0x36a   :  { %2227 = vsyncadd [#allocation4], 4294967168 }
 0x36b   :  { %1648 = vsyncpa [#allocation3], 1 }
 0x36c   :  { %1649 = vsyncpa [#allocation6], 1 }
 0x36d   :  { %1650 = vsyncpa [#allocation9], 1 }
 0x36e   :  { %1651 = vsyncpa [#allocation4], 1 }

</bundles_post_ra>
